<compile_context>
chip_gen: v7x
topology: tpu7x:2x2x1
jax: 0.10.0
libtpu: 0.0.40
codegen_flags: <defaults>
</compile_context>

<pallas_src>
import jax
import jax.numpy as jnp
from jax import lax
from jax.experimental import pallas as pl
from jax.experimental.pallas import tpu as pltpu


def _round_up(n, m):
    return ((n + m - 1) // m) * m


# ---------------------------------------------------------------------------
# Kernel
# ---------------------------------------------------------------------------
def _mlp_kernel(x_ref, wf_ref, bf_ref, w4t_ref, b4t_ref, o_ref):
    # x_ref: (tile_s, 2) f32
    # wf_ref: (2, Hp), bf_ref: (1, Hp)     -- collapsed linear1..3 (Hp = 896)
    # w4t_ref: (2, Hp), b4t_ref: (2, 1)    -- linear4, pre-transposed
    # o_ref: (2, tile_s)                   -- transposed, lane-dense output
    x = x_ref[...]

    # linear1->2->3 collapsed to one affine map; K == 2, so do it on the VPU
    # (two broadcast FMAs) instead of wasting an MXU pass on K=2.
    h = (x[:, 0:1] * wf_ref[0:1, :]
         + x[:, 1:2] * wf_ref[1:2, :]
         + bf_ref[...])                                   # (tile_s, Hp)
    h = jnp.maximum(h, 0.0)                               # relu

    # linear4, emitted directly in transposed orientation:
    #   o_T[k, m] = sum_h w4t[k, h] * h[m, h]   ->  (2, tile_s)
    o_t = lax.dot_general(
        w4t_ref[...], h,
        dimension_numbers=(((1,), (1,)), ((), ())),
        preferred_element_type=jnp.float32)

    o_ref[...] = o_t + b4t_ref[...]                       # bias broadcast on lanes


# ---------------------------------------------------------------------------
# Wrapper
# ---------------------------------------------------------------------------
def _pick_tile_s(B, S, want=512):
    """Row tile along S.  Must be a multiple of 128 (keeps the (tile,2) input
    block sublane-aligned and the (2,tile) output block lane-dense) unless a
    single block covers all of S (always legal)."""
    if S <= 128:
        return S
    if B == 1:
        # ensure >= 2 grid steps so both v7x TensorCores get work
        want = min(want, max(128, (S // 2) // 128 * 128))
    if S <= want:
        return S
    return (min(want, S) // 128) * 128


def model_forward(x1, fused):
    """Reproduces Model.forward: 4 linears + relu + transpose(1, 2)."""
    B, S, F = x1.shape
    assert F == 2
    tile_s = _pick_tile_s(B, S)
    grid = (B, pl.cdiv(S, tile_s))

    wf, bf = fused["wf"], fused["bf"]
    w4t, b4t = fused["w4t"], fused["b4t"]

    def resident(a):
        # Full-array block, constant block index -> DMA'd once, VMEM-resident.
        return pl.BlockSpec(a.shape, lambda b, i: tuple(0 for _ in a.shape))

    out = pl.pallas_call(
        _mlp_kernel,
        out_shape=jax.ShapeDtypeStruct((B, 2, S), jnp.float32),
        grid=grid,
        in_specs=[
            pl.BlockSpec((None, tile_s, F), lambda b, i: (b, i, 0)),
            resident(wf), resident(bf), resident(w4t), resident(b4t),
        ],
        out_specs=pl.BlockSpec((None, 2, tile_s), lambda b, i: (b, 0, i)),
        compiler_params=pltpu.CompilerParams(
            dimension_semantics=("parallel", "parallel")),
    )(x1, wf, bf, w4t, b4t)
    return out


# ---------------------------------------------------------------------------
# Parameters
# ---------------------------------------------------------------------------
def init_params(key):
    """torch.nn.Linear-style init (uniform +-1/sqrt(fan_in)), weights stored
    pre-transposed as (in, out), all float32."""
    dims = [(2, 257), (257, 512), (512, 801), (801, 2)]
    params = {}
    for i, (fan_in, fan_out) in enumerate(dims, start=1):
        key, kw, kb = jax.random.split(key, 3)
        bound = 1.0 / jnp.sqrt(float(fan_in))
        params[f"w{i}"] = jax.random.uniform(
            kw, (fan_in, fan_out), jnp.float32, -bound, bound)
        params[f"b{i}"] = jax.random.uniform(
            kb, (1, fan_out), jnp.float32, -bound, bound)
    return params


def fuse_params(params):
    """Collapse linear1..3 into one affine map and lane-pad to 896 columns.
    Done once, outside the kernel."""
    hi = lax.Precision.HIGHEST
    w1, b1 = params["w1"], params["b1"]
    w2, b2 = params["w2"], params["b2"]
    w3, b3 = params["w3"], params["b3"]
    w4, b4 = params["w4"], params["b4"]

    wf = jnp.dot(jnp.dot(w1, w2, precision=hi), w3, precision=hi)      # (2, 801)
    bf = (jnp.dot(jnp.dot(b1, w2, precision=hi), w3, precision=hi)
          + jnp.dot(b2, w3, precision=hi) + b3)                         # (1, 801)

    H = wf.shape[1]
    Hp = _round_up(max(H, 128), 128)          # 801 -> 896
    pad = Hp - H
    return {
        "wf":  jnp.pad(wf, ((0, 0), (0, pad))),
        "bf":  jnp.pad(bf, ((0, 0), (0, pad))),
        "w4t": jnp.pad(w4.T, ((0, 0), (0, pad))),   # (2, 896)
        "b4t": b4.T,                                 # (2, 1)
    }


# ---------------------------------------------------------------------------
# Pure-JAX fp32 reference (mirrors the PyTorch forward exactly)
# ---------------------------------------------------------------------------
def ref_forward(x1, params):
    hi = lax.Precision.HIGHEST

    def lin(x, i):
        return jnp.dot(x, params[f"w{i}"], precision=hi) + params[f"b{i}"]

    v = lin(x1, 1)
    v = lin(v, 2)
    v = lin(v, 3)
    v = jnp.maximum(v, 0.0)
    v = lin(v, 4)
    return jnp.transpose(v, (0, 2, 1))


# ---------------------------------------------------------------------------
if __name__ == "__main__":
    key = jax.random.PRNGKey(0)
    kx, kp = jax.random.split(key)

    params = init_params(kp)
    fused = fuse_params(params)

    # The module's own input shape: (1, 2, 2).
    x1 = jax.random.normal(kx, (1, 2, 2), dtype=jnp.float32)
    out = jax.block_until_ready(model_forward(x1, fused))
    assert out.shape == (1, 2, 2), out.shape
    assert out.dtype == jnp.float32
    ref = ref_forward(x1, params)
    assert jnp.allclose(out, ref, atol=5e-3, rtol=5e-3), (out, ref)

    # A couple of larger shapes to exercise the multi-tile grid + ragged tile.
    for (bb, ss) in [(2, 384), (1, 300)]:
        kx, sub = jax.random.split(kx)
        xt = jax.random.normal(sub, (bb, ss, 2), dtype=jnp.float32)
        ot = jax.block_until_ready(model_forward(xt, fused))
        rt = ref_forward(xt, params)
        assert ot.shape == (bb, 2, ss), ot.shape
        assert jnp.allclose(ot, rt, atol=5e-3, rtol=5e-3)

    print("KERNEL_OK")
</pallas_src>

<mosaic_0001>
module attributes {stable_mosaic.version = 11 : i64} {
  func.func @_mlp_kernel(%arg0: i32, %arg1: i32, %arg2: memref<1x2x2xf32, #tpu.memory_space<vmem>>, %arg3: memref<2x896xf32, #tpu.memory_space<vmem>>, %arg4: memref<1x896xf32, #tpu.memory_space<vmem>>, %arg5: memref<2x896xf32, #tpu.memory_space<vmem>>, %arg6: memref<2x1xf32, #tpu.memory_space<vmem>>, %arg7: memref<1x2x2xf32, #tpu.memory_space<vmem>>) attributes {dimension_semantics = [#tpu.dimension_semantics<parallel>, #tpu.dimension_semantics<parallel>], iteration_bounds = array<i64: 1, 1>, scalar_prefetch = 0 : i64, scratch_operands = 0 : i64, tpu.core_type = #tpu.core_type<tc>, window_params = [{transform_indices = @transform_0, window_bounds = array<i64: 1, 2, 2>}, {pipeline_mode = #tpu.pipeline_mode<synchronous>, transform_indices = @transform_1, window_bounds = array<i64: 2, 896>}, {pipeline_mode = #tpu.pipeline_mode<synchronous>, transform_indices = @transform_2, window_bounds = array<i64: 1, 896>}, {pipeline_mode = #tpu.pipeline_mode<synchronous>, transform_indices = @transform_3, window_bounds = array<i64: 2, 896>}, {pipeline_mode = #tpu.pipeline_mode<synchronous>, transform_indices = @transform_4, window_bounds = array<i64: 2, 1>}, {transform_indices = @transform_5, window_bounds = array<i64: 1, 2, 2>}]} {
    %c0 = arith.constant 0 : index
    %c0_0 = arith.constant 0 : index
    %c0_1 = arith.constant 0 : index
    %0 = vector.load %arg2[%c0, %c0_0, %c0_1] : memref<1x2x2xf32, #tpu.memory_space<vmem>>, vector<1x2x2xf32>
    %1 = vector.shape_cast %0 : vector<1x2x2xf32> to vector<2x2xf32>
    %2 = vector.extract_strided_slice %1 {offsets = [0, 0], sizes = [2, 1], strides = [1, 1]} : vector<2x2xf32> to vector<2x1xf32>
    %c0_2 = arith.constant 0 : index
    %c0_3 = arith.constant 0 : index
    %3 = vector.load %arg3[%c0_2, %c0_3] : memref<2x896xf32, #tpu.memory_space<vmem>>, vector<1x896xf32>
    %4 = vector.broadcast %2 : vector<2x1xf32> to vector<2x896xf32>
    %5 = vector.broadcast %3 : vector<1x896xf32> to vector<2x896xf32>
    %6 = arith.mulf %4, %5 : vector<2x896xf32>
    %7 = vector.extract_strided_slice %1 {offsets = [0, 1], sizes = [2, 1], strides = [1, 1]} : vector<2x2xf32> to vector<2x1xf32>
    %c1 = arith.constant 1 : index
    %c0_4 = arith.constant 0 : index
    %8 = vector.load %arg3[%c1, %c0_4] : memref<2x896xf32, #tpu.memory_space<vmem>>, vector<1x896xf32>
    %9 = vector.broadcast %7 : vector<2x1xf32> to vector<2x896xf32>
    %10 = vector.broadcast %8 : vector<1x896xf32> to vector<2x896xf32>
    %11 = arith.mulf %9, %10 : vector<2x896xf32>
    %12 = arith.addf %6, %11 : vector<2x896xf32>
    %c0_5 = arith.constant 0 : index
    %c0_6 = arith.constant 0 : index
    %13 = vector.load %arg4[%c0_5, %c0_6] : memref<1x896xf32, #tpu.memory_space<vmem>>, vector<1x896xf32>
    %14 = vector.broadcast %13 : vector<1x896xf32> to vector<2x896xf32>
    %15 = arith.addf %12, %14 : vector<2x896xf32>
    %cst = arith.constant 0.000000e+00 : f32
    %16 = vector.broadcast %cst : f32 to vector<2x896xf32>
    %17 = arith.maximumf %15, %16 : vector<2x896xf32>
    %c0_7 = arith.constant 0 : index
    %c0_8 = arith.constant 0 : index
    %18 = vector.load %arg5[%c0_7, %c0_8] : memref<2x896xf32, #tpu.memory_space<vmem>>, vector<2x896xf32>
    %cst_9 = arith.constant dense<0.000000e+00> : vector<2x2xf32>
    %19 = tpu.matmul %18, %17, %cst_9 {dimension_numbers = #tpu.dot_dimension_numbers<[1], [1], [0], [0], [0, 0, 1, 0], [], []>} : vector<2x896xf32>, vector<2x896xf32>, vector<2x2xf32> -> vector<2x2xf32>
    %c0_10 = arith.constant 0 : index
    %c0_11 = arith.constant 0 : index
    %20 = vector.load %arg6[%c0_10, %c0_11] : memref<2x1xf32, #tpu.memory_space<vmem>>, vector<2x1xf32>
    %21 = vector.broadcast %20 : vector<2x1xf32> to vector<2x2xf32>
    %22 = arith.addf %19, %21 : vector<2x2xf32>
    %c0_12 = arith.constant 0 : index
    %c0_13 = arith.constant 0 : index
    %c0_14 = arith.constant 0 : index
    %23 = vector.load %arg7[%c0_12, %c0_13, %c0_14] : memref<1x2x2xf32, #tpu.memory_space<vmem>>, vector<1x2x2xf32>
    %24 = vector.shape_cast %23 : vector<1x2x2xf32> to vector<2x2xf32>
    %25 = vector.shape_cast %22 : vector<2x2xf32> to vector<1x2x2xf32>
    tpu.vector_store %arg7[%c0_12, %c0_13, %c0_14], %25 {strides = array<i32>} : memref<1x2x2xf32, #tpu.memory_space<vmem>>, vector<1x2x2xf32>,
    return
  }
  func.func @transform_0(%arg0: i32, %arg1: i32) -> (i32, i32, i32) {
    %c0_i32 = arith.constant 0 : i32
    %c0_i32_0 = arith.constant 0 : i32
    return %arg0, %arg1, %c0_i32 : i32, i32, i32
  }
  func.func @transform_1(%arg0: i32, %arg1: i32) -> (i32, i32) {
    %c0_i32 = arith.constant 0 : i32
    %c0_i32_0 = arith.constant 0 : i32
    %c0_i32_1 = arith.constant 0 : i32
    return %c0_i32, %c0_i32_0 : i32, i32
  }
  func.func @transform_2(%arg0: i32, %arg1: i32) -> (i32, i32) {
    %c0_i32 = arith.constant 0 : i32
    %c0_i32_0 = arith.constant 0 : i32
    %c0_i32_1 = arith.constant 0 : i32
    return %c0_i32, %c0_i32_0 : i32, i32
  }
  func.func @transform_3(%arg0: i32, %arg1: i32) -> (i32, i32) {
    %c0_i32 = arith.constant 0 : i32
    %c0_i32_0 = arith.constant 0 : i32
    %c0_i32_1 = arith.constant 0 : i32
    return %c0_i32, %c0_i32_0 : i32, i32
  }
  func.func @transform_4(%arg0: i32, %arg1: i32) -> (i32, i32) {
    %c0_i32 = arith.constant 0 : i32
    %c0_i32_0 = arith.constant 0 : i32
    %c0_i32_1 = arith.constant 0 : i32
    return %c0_i32, %c0_i32_0 : i32, i32
  }
  func.func @transform_5(%arg0: i32, %arg1: i32) -> (i32, i32, i32) {
    %c0_i32 = arith.constant 0 : i32
    %c0_i32_0 = arith.constant 0 : i32
    return %arg0, %c0_i32, %arg1 : i32, i32, i32
  }
}

</mosaic_0001>

<bundles_post_ra>
// kernel: tpu_custom_call.1
= control target key start
LH: loop header
LB: loop body
LE: loop exit
PB: predicated region body
PF: predicated region fallthrough
CT: control target
= control target key end

     0   :  { %10 = vsyncpa [#allocation3], 0  ;;  %s797_s0 = inlined_call_operand.hbm [shape: f32[1,2,2], index: 0, kind: input, shape index: {}]   ;;  %s798_s1 = inlined_call_operand.hbm [shape: f32[2,896], index: 1, kind: input, shape index: {}]   ;;  %s799_s2 = inlined_call_operand.hbm [shape: f32[1,896], index: 2, kind: input, shape index: {}]   ;;  %s800_s3 = inlined_call_operand.vmem [shape: f32[2,896], index: 3, kind: input, shape index: {}]   ;;  %s801_s4 = inlined_call_operand.vmem [shape: f32[2,1], index: 4, kind: input, shape index: {}]   ;;  %s802_s5 = inlined_call_operand.hbm [shape: f32[1,2,2], index: 5, kind: output, shape index: {}]  }
   0x1   :  { %11 = vsyncpa [#allocation6], 0 }
   0x2   :  { %12 = vsyncpa [#allocation4], 0  ;;  %s683_s18 = smov [#allocation5]   ;;  %s684_s20 = smov [#allocation2]  }
   0x3   :  { %s29_s19 = sshll.u32 %s683_s18, 4  ;;  %s19_s21 = sshll.u32 %s684_s20, 4  ;;  %s30_s19 = int_to_ptr.vmem [resolvable:$true] %s29_s19  ;;  %s20_s21 = int_to_ptr.vmem [resolvable:$true] %s19_s21 }
   0x4   :  { %s589_s24 = scalar_lea.hbm %s798_s1, 224 }
   0x5   :  { %p590_p0 = scmp.ne.s32.totalorder %s798_s1, %s589_s24  ;;  %p593_p1 = scmp.lt.u32.totalorder %s589_s24, %s798_s1 }
   0x7   :  { %p595_p2 = pnand %p593_p1, %p590_p0 }
   0x9   :  { %598 = shalt.err (!%p595_p2)
}
   0xa   :  { %s599_s29 = scalar_lea.vmem %s30_s19, 224  ;;  %p604_p4 = scmp.lt.s32.totalorder %s30_s19, %s30_s19 }
   0xb   :  { %p600_p3 = scmp.ne.s32.totalorder %s30_s19, %s599_s29  ;;  %p605_p5 = scmp.lt.s32.totalorder %s599_s29, %s599_s29 }
   0xd   :  { %p606_p6 = por %p605_p5, %p604_p4 }
   0xf   :  { %p607_p7 = pnand %p606_p6, %p600_p3 }
  0x11   :  { %610 = shalt.err (!%p607_p7)
}
  0x12   :  { %32 = dma.hbm_to_vmem [thread:$0]  %s798_s1, 224, %s30_s19, [#allocation6]  }
  0x13   :  { %s611_s9 = scalar_lea.hbm %s797_s0, 32 }
  0x14   :  { %p612_p8 = scmp.ne.s32.totalorder %s797_s0, %s611_s9  ;;  %p615_p9 = scmp.lt.u32.totalorder %s611_s9, %s797_s0 }
  0x16   :  { %p617_p10 = pnand %p615_p9, %p612_p8 }
  0x18   :  { %620 = shalt.err (!%p617_p10)
}
  0x19   :  { %s621_s14 = scalar_lea.vmem %s20_s21, 32  ;;  %p626_p12 = scmp.lt.s32.totalorder %s20_s21, %s20_s21 }
  0x1a   :  { %p622_p11 = scmp.ne.s32.totalorder %s20_s21, %s621_s14  ;;  %p627_p13 = scmp.lt.s32.totalorder %s621_s14, %s621_s14 }
  0x1c   :  { %p628_p0 = por %p627_p13, %p626_p12 }
  0x1e   :  { %p629_p1 = pnand %p628_p0, %p622_p11 }
  0x20   :  { %632 = shalt.err (!%p629_p1)
}
  0x21   :  { %22 = dma.hbm_to_vmem [thread:$0]  %s797_s0, 32, %s20_s21, [#allocation3]  }
  0x22   :  { %s685_s16 = smov [#allocation7]   ;;  %s633_s20 = scalar_lea.hbm %s799_s2, 112 }
  0x23   :  { %s39_s17 = sshll.u32 %s685_s16, 4  ;;  %p634_p2 = scmp.ne.s32.totalorder %s799_s2, %s633_s20  ;;  %s40_s17 = int_to_ptr.vmem [resolvable:$true] %s39_s17 }
  0x24   :  { %p637_p3 = scmp.lt.u32.totalorder %s633_s20, %s799_s2 }
  0x26   :  { %p639_p4 = pnand %p637_p3, %p634_p2 }
  0x28   :  { %642 = shalt.err (!%p639_p4)
}
  0x29   :  { %s643_s26 = scalar_lea.vmem %s40_s17, 112  ;;  %s647_s0 = scalar_lea.vmem %s40_s17, 128 }
  0x2a   :  { %p644_p5 = scmp.ne.s32.totalorder %s40_s17, %s643_s26  ;;  %p648_p6 = scmp.lt.s32.totalorder %s40_s17, %s40_s17 }
  0x2b   :  { %p649_p7 = scmp.lt.s32.totalorder %s647_s0, %s643_s26 }
  0x2d   :  { %p650_p8 = por %p649_p7, %p648_p6 }
  0x2f   :  { %p651_p9 = pnand %p650_p8, %p644_p5 }
  0x31   :  { %654 = shalt.err (!%p651_p9)
}
  0x32   :  { %42 = dma.hbm_to_vmem [thread:$0]  %s799_s2, 112, %s40_s17, [#allocation6]  }
  0x33   :  { %677 = dma.done.wait [#allocation3], 32  }
  0x34   :  { %678 = vsyncadd [#allocation3], 4294967264 }
  0x35   :  { %679 = dma.done.wait [#allocation6], 336  }
  0x36   :  { %680 = vsyncadd [#allocation6], 4294966960  ;;  %v686_v0 = vmov 0   ;;  %v56_v1 = vld [vmem:[#allocation2] sm:$0x3]  ;;  %v687_v2 = vmov 1   ;;  %v64_v3 = vlaneseq }
  0x37   :  { %583 = vset.pattern.permute.xlu0 %v686_v0  ;;  %585 = vset.pattern.permute.xlu1 %v686_v0  ;;  %v688_v4 = vmov 1983009808   ;;  %v213_v9 = vld [vmem:[%s800_s3] sm:$0xff]  ;;  %v214_v10 = vld [vmem:[%s800_s3 + $0x8] sm:$0x3f]  ;;  %v162_v33 = vld [vmem:[#allocation7] sm:$0xff] }
  0x38   :  { %60 = vperm.xlu0 %583, %v56_v1   ;;  %v225_v5 = vunpack.c.l.s4 %v688_v4  ;;  %v65_v6 = vshrl.u32 %v64_v3, 7  ;;  %v223_v13 = vcombine.high %v213_v9, %v213_v9  ;;  %v240_v15 = vcombine.high %v214_v10, %v214_v10  ;;  %v215_v19 = vld [vmem:[%s801_s4] sm:$0x3]  ;;  %v107_v20 = vld [vmem:[#allocation5 + $0x1] ss:$2 sm:$0xff]  ;;  %s691_s4 = smov [#allocation8]  }
  0x39   :  { %218 = vperm.xlu1 %585, %v215_v19   ;;  %v57_v27 = vld [vmem:[#allocation5] ss:$2 sm:$0xff]  ;;  %vm690_vm0 = vmmov 0   ;;  %s551_s7 = sshll.u32 %s691_s4, 4  ;;  %vm543_vm1 = vcmask 9216   ;;  %s552_s7 = int_to_ptr.vmem [resolvable:$true] %s551_s7 }
  0x3a   :  { %v226_v7 = vunpack.c.0.s8 %v225_v5  ;;  %v70_v21 = vsub.s32 1, %v65_v6  ;;  %v86_v22 = vsub.s32 5, %v65_v6  ;;  %v66_v23 = vsub.s32 0, %v65_v6  ;;  %s655_s8 = scalar_lea.vmem %s552_s7, 32  ;;  %p660_p11 = scmp.lt.s32.totalorder %s552_s7, %s552_s7 }
  0x3b   :  { %v82_v24 = vsub.s32 4, %v65_v6  ;;  %v74_v25 = vsub.s32 2, %v65_v6  ;;  %v90_v26 = vsub.s32 6, %v65_v6  ;;  %v78_v28 = vsub.s32 3, %v65_v6  ;;  %p656_p10 = scmp.ne.s32.totalorder %s552_s7, %s655_s8  ;;  %p661_p12 = scmp.lt.s32.totalorder %s655_s8, %s655_s8 }
  0x3c   :  { %584 = vset.pattern.permute.xlu0 %v687_v2  ;;  %v229_v8 = vsub.s32 %v226_v7, %v65_v6  ;;  %v71_v32 = vrot.slane %v57_v27, %v70_v21  ;;  %v87_v34 = vrot.slane %v57_v27, %v86_v22  ;;  %v67_v35 = vrot.slane %v57_v27, %v66_v23 }
  0x3d   :  { %109 = vperm.xlu0 %584, %v56_v1   ;;  %v124_v29 = vrot.slane %v107_v20, %v74_v25  ;;  %v140_v30 = vrot.slane %v107_v20, %v90_v26  ;;  %v83_v36 = vrot.slane %v57_v27, %v82_v24  ;;  %v120_v37 = vrot.slane %v107_v20, %v70_v21  ;;  %p662_p13 = por %p661_p12, %p660_p11 }
  0x3e   :  { %v764_v11 = vrot.slane %v213_v9, %v229_v8  ;;  %v766_v12 = vrot.slane %v214_v10, %v229_v8  ;;  %v772_v17 = vrot.slane %v240_v15, %v229_v8  ;;  %v774_v18 = vrot.slane %v223_v13, %v229_v8 }
  0x3f   :  { %v79_v38 = vrot.slane %v57_v27, %v78_v28  ;;  %v75_v39 = vrot.slane %v57_v27, %v74_v25  ;;  %v91_v40 = vrot.slane %v57_v27, %v90_v26  ;;  %v136_v41 = vrot.slane %v107_v20, %v86_v22  ;;  %p663_p0 = pnand %p662_p13, %p656_p10 }
  0x40   :  { %v238_v14 = vcombine.high %v764_v11, %v764_v11  ;;  %v255_v16 = vcombine.high %v766_v12, %v766_v12  ;;  %v116_v42 = vrot.slane %v107_v20, %v66_v23  ;;  %v132_v43 = vrot.slane %v107_v20, %v82_v24 }
  0x41   :  { %586 = vset.pattern.permute.xlu0 %v686_v0  ;;  %v128_v44 = vrot.slane %v107_v20, %v78_v28  ;;  %v171_v45 = vrot.slane %v162_v33, %v70_v21  ;;  %v187_v46 = vrot.slane %v162_v33, %v86_v22  ;;  %v167_v47 = vrot.slane %v162_v33, %v66_v23 }
  0x42   :  { %327 = vmatprep.mubr.f32.mxu1 %v238_v14  ;;  %467 = vmatprep.mubr.f32.mxu0 %v255_v16  ;;  %v183_v48 = vrot.slane %v162_v33, %v82_v24  ;;  %v179_v51 = vrot.slane %v162_v33, %v78_v28  ;;  %v175_v52 = vrot.slane %v162_v33, %v74_v25 }
  0x43   :  { %v191_v5 = vrot.slane %v162_v33, %v90_v26  ;;  %v689_v26 = vmov 0.0   ;;  %v239_v27 = vcombine.high %v774_v18, %v774_v18 }
  0xb7   :  { %v61_v31 = vpop.permute.xlu0 %60 }
  0xb8   :  { %v100_v49 = vmul.f32 %v71_v32, %v61_v31  ;;  %v104_v50 = vmul.f32 %v87_v34, %v61_v31  ;;  %v99_v54 = vmul.f32 %v67_v35, %v61_v31  ;;  %v103_v55 = vmul.f32 %v83_v36, %v61_v31 }
  0xb9   :  { %v102_v56 = vmul.f32 %v79_v38, %v61_v31  ;;  %v101_v57 = vmul.f32 %v75_v39, %v61_v31  ;;  %v105_v1 = vmul.f32 %v91_v40, %v61_v31 }
  0xbc   :  { %v110_v53 = vpop.permute.xlu0 %109 }
  0xbd   :  { %v150_v58 = vmul.f32 %v124_v29, %v110_v53  ;;  %v154_v59 = vmul.f32 %v140_v30, %v110_v53  ;;  %v149_v60 = vmul.f32 %v120_v37, %v110_v53  ;;  %v153_v61 = vmul.f32 %v136_v41, %v110_v53  ;;  %v219_v30 = vpop.permute.xlu1 %218 }
  0xbe   :  { %v148_v62 = vmul.f32 %v116_v42, %v110_v53  ;;  %v152_v63 = vmul.f32 %v132_v43, %v110_v53  ;;  %v151_v0 = vmul.f32 %v128_v44, %v110_v53 }
  0xbf   :  { %v156_v2 = vadd.f32 %v149_v60, %v100_v49  ;;  %v160_v3 = vadd.f32 %v153_v61, %v104_v50  ;;  %v157_v4 = vadd.f32 %v150_v58, %v101_v57  ;;  %v161_v9 = vadd.f32 %v154_v59, %v105_v1 }
  0xc0   :  { %v155_v6 = vadd.f32 %v148_v62, %v99_v54  ;;  %v159_v7 = vadd.f32 %v152_v63, %v103_v55  ;;  %v158_v8 = vadd.f32 %v151_v0, %v102_v56 }
  0xc1   :  { %v200_v10 = vadd.f32 %v171_v45, %v156_v2  ;;  %v204_v13 = vadd.f32 %v187_v46, %v160_v3  ;;  %v201_v23 = vadd.f32 %v175_v52, %v157_v4  ;;  %v205_v24 = vadd.f32 %v191_v5, %v161_v9 }
  0xc2   :  { %v199_v14 = vadd.f32 %v167_v47, %v155_v6  ;;  %v203_v15 = vadd.f32 %v183_v48, %v159_v7  ;;  %v202_v16 = vadd.f32 %v179_v51, %v158_v8 }
  0xc3   :  { %v207_v19 = vmax.f32 %v200_v10, 0.0  ;;  %v211_v20 = vmax.f32 %v204_v13, 0.0  ;;  %v208_v28 = vmax.f32 %v201_v23, 0.0  ;;  %v212_v29 = vmax.f32 %v205_v24, 0.0 }
  0xc4   :  { %v206_v21 = vmax.f32 %v199_v14, 0.0  ;;  %v210_v22 = vmax.f32 %v203_v15, 0.0  ;;  %v209_v25 = vmax.f32 %v202_v16, 0.0 }
  0xc5   :  { %263 = vmatprep.subr.mxu1 %v207_v19  ;;  %403 = vmatprep.subr.mxu0 %v211_v20 }
  0xc6   :  { %264 = vmatpush1.xpose.msra.mxu1 %v206_v21  ;;  %404 = vmatpush1.xpose.msra.mxu0 %v210_v22 }
  0xc7   :  { %333 = vmatprep.subr.mxu1 %v209_v25  ;;  %563 = vmatprep.subr.mxu0 %v689_v26 }
  0xc9   :  { %328 = vmatmul.mubr.f32.vlgmr.msra.gmra.mrb[0].mxu1 %v764_v11  ;;  %468 = vmatmul.mubr.f32.vlgmr.msra.gmra.mrb[0].mxu0 %v766_v12 }
  0xca   :  { %334 = vmatpush1.xpose.msra.mxu1 %v208_v28  ;;  %564 = vmatpush3.xpose.msra.mxu0 %v212_v29 }
  0xcb   :  { %397 = vmatprep.mubr.f32.mxu1 %v239_v27  ;;  %565 = vmatprep.mubr.msk.f32.mxu0 %vm690_vm0, %v689_v26 }
  0xd1   :  { %398 = vmatmul.mubr.f32.vlgmr.msra.gmra.mrb[0].mxu1 %v774_v18  ;;  %566 = vmatmul.mubr.f32.vlgmr.msra.gmra.mrb[0].mxu0 %v772_v17 }
 0x1a4   :  { %v399_v31 = vpop.f32.mrb[0].mxu1  ;;  %v539_v32 = vpop.f32.mrb[0].mxu0 }
 0x1a5   :  { %v568_v33 = vadd.f32 %v399_v31, %v219_v30  ;;  %v401_v34 = vpop.f32.mrb[1].mxu1  ;;  %v567_v35 = vpop.f32.mrb[1].mxu0 }
 0x1a7   :  { %v569_v11 = vadd.f32 %v568_v33, %v539_v32 }
 0x1a9   :  { %544 = vst.msk [vmem:[#allocation8] sm:$0x3] %vm543_vm1, %v569_v11 }
 0x1aa   :  { %666 = shalt.err (!%p663_p0)
}
 0x1ab   :  { %s667_s11 = scalar_lea.hbm %s802_s5, 32 }
 0x1ac   :  { %p668_p1 = scmp.ne.s32.totalorder %s802_s5, %s667_s11  ;;  %p671_p2 = scmp.lt.u32.totalorder %s667_s11, %s802_s5 }
 0x1ae   :  { %p673_p3 = pnand %p671_p2, %p668_p1 }
 0x1b0   :  { %676 = shalt.err (!%p673_p3)
}
 0x1b1   :  { %554 = dma.vmem_to_hbm [thread:$0]  %s552_s7, 32, %s802_s5, [#allocation4]  }
 0x1b2   :  { %681 = dma.done.wait [#allocation4], 32  }
 0x1b3   :  { %682 = vsyncadd [#allocation4], 4294967264 }
 0x1b4   :  { %558 = vsyncpa [#allocation3], 1 }
 0x1b5   :  { %559 = vsyncpa [#allocation6], 1 }
 0x1b6   :  { %560 = vsyncpa [#allocation4], 1 }

</bundles_post_ra>
